<compile_context>
chip_gen: v5e
topology: v5e:2x2
jax: 0.10.0
libtpu: 0.0.40
codegen_flags: <defaults>
</compile_context>

<pallas_src>
import functools

import jax
import jax.numpy as jnp
from jax import lax
from jax.experimental import pallas as pl
from jax.experimental.pallas import tpu as pltpu


# ---------------------------------------------------------------------------
# Fused kernel body
# ---------------------------------------------------------------------------

def _fused_inverted_residual_kernel(x_ref, w1_ref, b1_ref, wdw_ref, bd_ref,
                                    w2_ref, b2_ref, m_ref, o_ref, hp_ref,
                                    *, nb, cpg, H, W):
    """Fused InvertedResidual (benchmodel=1, stride=1) for `nb` images.

    x_ref  : (nb, 2, cpg, H*W)  input, [.,0]=x1 half, [.,1]=x2 half (f32/x dtype)
    w1_ref : (cpg, cpg) bf16    1x1 conv #1 weights with BN1 scale folded in
    b1_ref : (cpg, 1)   f32     BN1 bias
    wdw_ref: (cpg, 9)   f32     depthwise taps (k = 3*dy + dx) with BNd scale folded
    bd_ref : (cpg, 1)   f32     BNd bias
    w2_ref : (cpg, cpg) bf16    1x1 conv #2 weights with BN2 scale folded in
    b2_ref : (cpg, 1)   f32     BN2 bias
    m_ref  : (2, H*W)   f32     column masks: [0] kills x==0 (ox=-1 taps),
                                              [1] kills x==W-1 (ox=+1 taps)
    o_ref  : (nb, cpg, 2*H*W)   shuffled output (even/odd channel interleave)
    hp_ref : (nb, cpg, H*W+2W+2) VMEM scratch: zero-padded flat h slab
    """
    HW = H * W
    pad = W + 1
    f32 = jnp.float32

    mask_l = m_ref[0:1, :]            # (1, HW)
    mask_r = m_ref[1:2, :]            # (1, HW)
    zeros_pad = jnp.zeros((cpg, pad), dtype=f32)

    for i in range(nb):
        x1 = x_ref[i, 0]              # (cpg, HW) - passthrough half
        x2 = x_ref[i, 1]              # (cpg, HW) - branch2 input

        # ---- stage 1: 1x1 conv (MXU, bf16 operands, f32 acc) + BN bias + ReLU
        h = jnp.dot(w1_ref[...], x2.astype(jnp.bfloat16),
                    preferred_element_type=f32)
        h = jnp.maximum(h + b1_ref[...], 0.0)                    # (cpg, HW) f32

        # ---- stage 2: 3x3 depthwise conv, stride 1, zero pad 1 (lane-dense VPU)
        # zero-padded flat slab: hp[q] = 0 for q<pad or q>=pad+HW, h for interior
        hp_ref[i, :, 0:pad] = zeros_pad
        hp_ref[i, :, pad + HW:pad + HW + pad] = zeros_pad
        hp_ref[i, :, pad:pad + HW] = h

        acc = None
        for ox in (-1, 0, 1):
            part = None
            for oy in (-1, 0, 1):
                k = (oy + 1) * 3 + (ox + 1)                       # tap index
                start = pad + oy * W + ox
                sl = hp_ref[i, :, start:start + HW]               # (cpg, HW)
                term = sl * wdw_ref[:, k:k + 1]                   # per-chan tap
                part = term if part is None else part + term
            if ox == -1:
                part = part * mask_l          # kill row-wrap reads at x == 0
            elif ox == 1:
                part = part * mask_r          # kill row-wrap reads at x == W-1
            acc = part if acc is None else acc + part
        d = acc + bd_ref[...]                                     # (cpg, HW) f32

        # ---- stage 3: 1x1 conv + BN bias + ReLU, fused with concat + shuffle(2)
        # shuffled output as (cpg, 2, HW): even slot = x1, odd slot = branch2
        y = jnp.dot(w2_ref[...], d.astype(jnp.bfloat16),
                    preferred_element_type=f32)
        y = jnp.maximum(y + b2_ref[...], 0.0)
        o_ref[i, :, 0:HW] = x1.astype(o_ref.dtype)
        o_ref[i, :, HW:2 * HW] = y.astype(o_ref.dtype)


# ---------------------------------------------------------------------------
# Wrapper
# ---------------------------------------------------------------------------

def _fold_bn(gamma, beta, mean, var, eps=1e-5):
    scale = gamma / jnp.sqrt(var + eps)
    bias = beta - mean * scale
    return scale, bias


def _pick_batch_block(N):
    """Largest images-per-step block that divides N and keeps >=2 grid steps."""
    best = 1
    for nb in (2, 4, 8):
        if N % nb == 0 and N // nb >= 2:
            best = nb
    return best


def inverted_residual_forward(x, params):
    """InvertedResidual forward (benchmodel=1, stride=1), inference-mode BN."""
    N, C, H, W = x.shape
    assert C % 2 == 0
    cpg = C // 2                      # oup_inc == channels per shuffle group
    HW = H * W
    f32 = jnp.float32

    s1, b1 = _fold_bn(params["bn1_gamma"], params["bn1_beta"],
                      params["bn1_mean"], params["bn1_var"])
    sd, bd = _fold_bn(params["bnd_gamma"], params["bnd_beta"],
                      params["bnd_mean"], params["bnd_var"])
    s2, b2 = _fold_bn(params["bn2_gamma"], params["bn2_beta"],
                      params["bn2_mean"], params["bn2_var"])

    # Fold BN scales into the conv weights on the host (exact algebra); the 1x1
    # conv weights are fed to the MXU in bf16, the depthwise taps stay f32 (VPU).
    w1f = (params["w1"].astype(f32) * s1[:, None]).astype(jnp.bfloat16)
    w2f = (params["w2"].astype(f32) * s2[:, None]).astype(jnp.bfloat16)
    wdwf = params["wdw"].reshape(cpg, 9).astype(f32) * sd[:, None]

    # Column-validity masks for the ox = -1 / +1 depthwise taps (guard against
    # row wrap in the flattened lane-dense layout).
    col = jnp.arange(HW, dtype=jnp.int32) % W
    masks = jnp.stack([(col >= 1), (col <= W - 2)]).astype(f32)   # (2, HW)

    # Free layout plumbing: channels on sublanes, H*W flattened onto lanes.
    # x_r[:, 0] is the x1 half, x_r[:, 1] is the x2 half (a view, no copy).
    x_r = x.reshape(N, 2, cpg, HW)

    nb = _pick_batch_block(N)
    grid = (N // nb,)

    # Rough per-step VMEM budget (in/out double buffers + scratch + temporaries),
    # capped at 64 MiB so the same choice is safe on v7x's smaller VMEM.
    per_step_bytes = 4 * nb * cpg * HW * 20
    vmem_limit = int(min(64 * 1024 * 1024, max(per_step_bytes, 16 * 1024 * 1024)))

    kernel = functools.partial(_fused_inverted_residual_kernel,
                               nb=nb, cpg=cpg, H=H, W=W)
    out_flat = pl.pallas_call(
        kernel,
        out_shape=jax.ShapeDtypeStruct((N, cpg, 2 * HW), x.dtype),
        grid=grid,
        in_specs=[
            pl.BlockSpec((nb, 2, cpg, HW), lambda n: (n, 0, 0, 0)),   # x
            pl.BlockSpec((cpg, cpg), lambda n: (0, 0)),               # w1 (bf16)
            pl.BlockSpec((cpg, 1), lambda n: (0, 0)),                 # b1
            pl.BlockSpec((cpg, 9), lambda n: (0, 0)),                 # wdw*sd
            pl.BlockSpec((cpg, 1), lambda n: (0, 0)),                 # bd
            pl.BlockSpec((cpg, cpg), lambda n: (0, 0)),               # w2 (bf16)
            pl.BlockSpec((cpg, 1), lambda n: (0, 0)),                 # b2
            pl.BlockSpec((2, HW), lambda n: (0, 0)),                  # col masks
        ],
        out_specs=pl.BlockSpec((nb, cpg, 2 * HW), lambda n: (n, 0, 0)),
        scratch_shapes=[pltpu.VMEM((nb, cpg, HW + 2 * (W + 1)), f32)],
        compiler_params=pltpu.CompilerParams(
            dimension_semantics=("parallel",),
            vmem_limit_bytes=vmem_limit,
        ),
    )(x_r, w1f, b1.reshape(cpg, 1), wdwf, bd.reshape(cpg, 1),
      w2f, b2.reshape(cpg, 1), masks)

    # (N, cpg, 2*H*W) is exactly the shuffled (N, C, H, W) in row-major order.
    return out_flat.reshape(N, C, H, W)


# ---------------------------------------------------------------------------
# Pure-JAX reference (mirrors the PyTorch module, inference-mode BN)
# ---------------------------------------------------------------------------

def inverted_residual_ref(x, params):
    N, C, H, W = x.shape
    cpg = C // 2
    x1, x2 = x[:, :cpg], x[:, cpg:]
    dn = ("NCHW", "OIHW", "NCHW")

    def bn(y, gamma, beta, mean, var, eps=1e-5):
        scale = gamma / jnp.sqrt(var + eps)
        bias = beta - mean * scale
        return y * scale.reshape(1, -1, 1, 1) + bias.reshape(1, -1, 1, 1)

    h = lax.conv_general_dilated(x2, params["w1"][:, :, None, None], (1, 1),
                                 "VALID", dimension_numbers=dn)
    h = jax.nn.relu(bn(h, params["bn1_gamma"], params["bn1_beta"],
                       params["bn1_mean"], params["bn1_var"]))
    d = lax.conv_general_dilated(h, params["wdw"][:, None, :, :], (1, 1),
                                 ((1, 1), (1, 1)), feature_group_count=cpg,
                                 dimension_numbers=dn)
    d = bn(d, params["bnd_gamma"], params["bnd_beta"],
           params["bnd_mean"], params["bnd_var"])
    y = lax.conv_general_dilated(d, params["w2"][:, :, None, None], (1, 1),
                                 "VALID", dimension_numbers=dn)
    y = jax.nn.relu(bn(y, params["bn2_gamma"], params["bn2_beta"],
                       params["bn2_mean"], params["bn2_var"]))
    out = jnp.concatenate([x1, y], axis=1)
    return (out.reshape(N, 2, C // 2, H, W)
               .transpose(0, 2, 1, 3, 4)
               .reshape(N, C, H, W))


if __name__ == "__main__":
    key = jax.random.PRNGKey(0)
    N, C, H, W = 2, 4, 16, 16          # inp = oup = 4, stride = 1, benchmodel = 1
    cpg = C // 2

    keys = jax.random.split(key, 16)
    x = jax.random.normal(keys[0], (N, C, H, W), dtype=jnp.float32)
    params = {
        "w1":  jax.random.normal(keys[1], (cpg, cpg), dtype=jnp.float32) * 0.5,
        "wdw": jax.random.normal(keys[2], (cpg, 3, 3), dtype=jnp.float32) * 0.5,
        "w2":  jax.random.normal(keys[3], (cpg, cpg), dtype=jnp.float32) * 0.5,
        "bn1_gamma": jax.random.uniform(keys[4], (cpg,), minval=0.5, maxval=1.5),
        "bn1_beta":  jax.random.normal(keys[5], (cpg,)) * 0.1,
        "bn1_mean":  jax.random.normal(keys[6], (cpg,)) * 0.1,
        "bn1_var":   jax.random.uniform(keys[7], (cpg,), minval=0.5, maxval=1.5),
        "bnd_gamma": jax.random.uniform(keys[8], (cpg,), minval=0.5, maxval=1.5),
        "bnd_beta":  jax.random.normal(keys[9], (cpg,)) * 0.1,
        "bnd_mean":  jax.random.normal(keys[10], (cpg,)) * 0.1,
        "bnd_var":   jax.random.uniform(keys[11], (cpg,), minval=0.5, maxval=1.5),
        "bn2_gamma": jax.random.uniform(keys[12], (cpg,), minval=0.5, maxval=1.5),
        "bn2_beta":  jax.random.normal(keys[13], (cpg,)) * 0.1,
        "bn2_mean":  jax.random.normal(keys[14], (cpg,)) * 0.1,
        "bn2_var":   jax.random.uniform(keys[15], (cpg,), minval=0.5, maxval=1.5),
    }

    fwd = jax.jit(inverted_residual_forward)
    out = jax.block_until_ready(fwd(x, params))
    ref = inverted_residual_ref(x, params)

    assert out.shape == (N, C, H, W)
    assert out.dtype == x.dtype
    max_err = jnp.max(jnp.abs(out - ref))
    # Tolerance loosened because the 1x1-conv MXU operands are bf16 (f32 acc);
    # the f32 reference differs at the ~1e-2 level as noted in the perf review.
    assert jnp.allclose(out, ref, atol=5e-2, rtol=5e-2), (
        f"Pallas InvertedResidual mismatch vs reference (max abs err={max_err})")
    print("KERNEL_OK")
</pallas_src>

<mosaic_0001>
module attributes {stable_mosaic.version = 11 : i64} {
  func.func @_fused_inverted_residual_kernel(%arg0: i32, %arg1: memref<1x2x2x256xf32, #tpu.memory_space<vmem>>, %arg2: memref<2x2xbf16, #tpu.memory_space<vmem>>, %arg3: memref<2x1xf32, #tpu.memory_space<vmem>>, %arg4: memref<2x9xf32, #tpu.memory_space<vmem>>, %arg5: memref<2x1xf32, #tpu.memory_space<vmem>>, %arg6: memref<2x2xbf16, #tpu.memory_space<vmem>>, %arg7: memref<2x1xf32, #tpu.memory_space<vmem>>, %arg8: memref<2x256xf32, #tpu.memory_space<vmem>>, %arg9: memref<1x2x512xf32, #tpu.memory_space<vmem>>, %arg10: memref<1x2x290xf32, #tpu.memory_space<vmem>>) attributes {dimension_semantics = [#tpu.dimension_semantics<parallel>], iteration_bounds = array<i64: 2>, scalar_prefetch = 0 : i64, scratch_operands = 1 : i64, tpu.core_type = #tpu.core_type<tc>, window_params = [{transform_indices = @transform_0, window_bounds = array<i64: 1, 2, 2, 256>}, {pipeline_mode = #tpu.pipeline_mode<synchronous>, transform_indices = @transform_1, window_bounds = array<i64: 2, 2>}, {pipeline_mode = #tpu.pipeline_mode<synchronous>, transform_indices = @transform_2, window_bounds = array<i64: 2, 1>}, {pipeline_mode = #tpu.pipeline_mode<synchronous>, transform_indices = @transform_3, window_bounds = array<i64: 2, 9>}, {pipeline_mode = #tpu.pipeline_mode<synchronous>, transform_indices = @transform_4, window_bounds = array<i64: 2, 1>}, {pipeline_mode = #tpu.pipeline_mode<synchronous>, transform_indices = @transform_5, window_bounds = array<i64: 2, 2>}, {pipeline_mode = #tpu.pipeline_mode<synchronous>, transform_indices = @transform_6, window_bounds = array<i64: 2, 1>}, {pipeline_mode = #tpu.pipeline_mode<synchronous>, transform_indices = @transform_7, window_bounds = array<i64: 2, 256>}, {transform_indices = @transform_8, window_bounds = array<i64: 1, 2, 512>}]} {
    %c0 = arith.constant 0 : index
    %c0_0 = arith.constant 0 : index
    %0 = vector.load %arg8[%c0, %c0_0] : memref<2x256xf32, #tpu.memory_space<vmem>>, vector<1x256xf32>
    %c1 = arith.constant 1 : index
    %c0_1 = arith.constant 0 : index
    %1 = vector.load %arg8[%c1, %c0_1] : memref<2x256xf32, #tpu.memory_space<vmem>>, vector<1x256xf32>
    %cst = arith.constant 0.000000e+00 : f32
    %2 = vector.broadcast %cst : f32 to vector<2x17xf32>
    %c0_2 = arith.constant 0 : index
    %c0_3 = arith.constant 0 : index
    %c0_4 = arith.constant 0 : index
    %c0_5 = arith.constant 0 : index
    %3 = vector.load %arg1[%c0_2, %c0_3, %c0_4, %c0_5] : memref<1x2x2x256xf32, #tpu.memory_space<vmem>>, vector<1x1x2x256xf32>
    %4 = vector.shape_cast %3 : vector<1x1x2x256xf32> to vector<2x256xf32>
    %c0_6 = arith.constant 0 : index
    %c1_7 = arith.constant 1 : index
    %c0_8 = arith.constant 0 : index
    %c0_9 = arith.constant 0 : index
    %5 = vector.load %arg1[%c0_6, %c1_7, %c0_8, %c0_9] : memref<1x2x2x256xf32, #tpu.memory_space<vmem>>, vector<1x1x2x256xf32>
    %6 = vector.shape_cast %5 : vector<1x1x2x256xf32> to vector<2x256xf32>
    %c0_10 = arith.constant 0 : index
    %c0_11 = arith.constant 0 : index
    %7 = vector.load %arg2[%c0_10, %c0_11] : memref<2x2xbf16, #tpu.memory_space<vmem>>, vector<2x2xbf16>
    %8 = arith.truncf %6 : vector<2x256xf32> to vector<2x256xbf16>
    %cst_12 = arith.constant dense<0.000000e+00> : vector<2x256xf32>
    %9 = tpu.matmul %7, %8, %cst_12 {dimension_numbers = #tpu.dot_dimension_numbers<[1], [0], [0], [1], [0, 0, 1, 1], [], []>} : vector<2x2xbf16>, vector<2x256xbf16>, vector<2x256xf32> -> vector<2x256xf32>
    %c0_13 = arith.constant 0 : index
    %c0_14 = arith.constant 0 : index
    %10 = vector.load %arg3[%c0_13, %c0_14] : memref<2x1xf32, #tpu.memory_space<vmem>>, vector<2x1xf32>
    %11 = vector.broadcast %10 : vector<2x1xf32> to vector<2x256xf32>
    %12 = arith.addf %9, %11 : vector<2x256xf32>
    %cst_15 = arith.constant 0.000000e+00 : f32
    %13 = vector.broadcast %cst_15 : f32 to vector<2x256xf32>
    %14 = arith.maximumf %12, %13 : vector<2x256xf32>
    %c0_16 = arith.constant 0 : index
    %c0_17 = arith.constant 0 : index
    %c0_18 = arith.constant 0 : index
    %15 = vector.load %arg10[%c0_16, %c0_17, %c0_18] : memref<1x2x290xf32, #tpu.memory_space<vmem>>, vector<1x2x17xf32>
    %16 = vector.shape_cast %15 : vector<1x2x17xf32> to vector<2x17xf32>
    %17 = vector.shape_cast %2 : vector<2x17xf32> to vector<1x2x17xf32>
    tpu.vector_store %arg10[%c0_16, %c0_17, %c0_18], %17 {strides = array<i32>} : memref<1x2x290xf32, #tpu.memory_space<vmem>>, vector<1x2x17xf32>,
    %c0_19 = arith.constant 0 : index
    %c0_20 = arith.constant 0 : index
    %c273 = arith.constant 273 : index
    %18 = vector.load %arg10[%c0_19, %c0_20, %c273] : memref<1x2x290xf32, #tpu.memory_space<vmem>>, vector<1x2x17xf32>
    %19 = vector.shape_cast %18 : vector<1x2x17xf32> to vector<2x17xf32>
    %20 = vector.shape_cast %2 : vector<2x17xf32> to vector<1x2x17xf32>
    tpu.vector_store %arg10[%c0_19, %c0_20, %c273], %20 {strides = array<i32>} : memref<1x2x290xf32, #tpu.memory_space<vmem>>, vector<1x2x17xf32>,
    %c0_21 = arith.constant 0 : index
    %c0_22 = arith.constant 0 : index
    %c17 = arith.constant 17 : index
    %21 = vector.load %arg10[%c0_21, %c0_22, %c17] : memref<1x2x290xf32, #tpu.memory_space<vmem>>, vector<1x2x256xf32>
    %22 = vector.shape_cast %21 : vector<1x2x256xf32> to vector<2x256xf32>
    %23 = vector.shape_cast %14 : vector<2x256xf32> to vector<1x2x256xf32>
    tpu.vector_store %arg10[%c0_21, %c0_22, %c17], %23 {strides = array<i32>} : memref<1x2x290xf32, #tpu.memory_space<vmem>>, vector<1x2x256xf32>,
    %c0_23 = arith.constant 0 : index
    %c0_24 = arith.constant 0 : index
    %c0_25 = arith.constant 0 : index
    %24 = vector.load %arg10[%c0_23, %c0_24, %c0_25] : memref<1x2x290xf32, #tpu.memory_space<vmem>>, vector<1x2x256xf32>
    %25 = vector.shape_cast %24 : vector<1x2x256xf32> to vector<2x256xf32>
    %c0_26 = arith.constant 0 : index
    %c0_27 = arith.constant 0 : index
    %26 = vector.load %arg4[%c0_26, %c0_27] : memref<2x9xf32, #tpu.memory_space<vmem>>, vector<2x1xf32>
    %27 = vector.broadcast %26 : vector<2x1xf32> to vector<2x256xf32>
    %28 = arith.mulf %25, %27 : vector<2x256xf32>
    %c0_28 = arith.constant 0 : index
    %c0_29 = arith.constant 0 : index
    %c16 = arith.constant 16 : index
    %29 = vector.load %arg10[%c0_28, %c0_29, %c16] : memref<1x2x290xf32, #tpu.memory_space<vmem>>, vector<1x2x256xf32>
    %30 = vector.shape_cast %29 : vector<1x2x256xf32> to vector<2x256xf32>
    %c0_30 = arith.constant 0 : index
    %c3 = arith.constant 3 : index
    %31 = vector.load %arg4[%c0_30, %c3] : memref<2x9xf32, #tpu.memory_space<vmem>>, vector<2x1xf32>
    %32 = vector.broadcast %31 : vector<2x1xf32> to vector<2x256xf32>
    %33 = arith.mulf %30, %32 : vector<2x256xf32>
    %34 = arith.addf %28, %33 : vector<2x256xf32>
    %c0_31 = arith.constant 0 : index
    %c0_32 = arith.constant 0 : index
    %c32 = arith.constant 32 : index
    %35 = vector.load %arg10[%c0_31, %c0_32, %c32] : memref<1x2x290xf32, #tpu.memory_space<vmem>>, vector<1x2x256xf32>
    %36 = vector.shape_cast %35 : vector<1x2x256xf32> to vector<2x256xf32>
    %c0_33 = arith.constant 0 : index
    %c6 = arith.constant 6 : index
    %37 = vector.load %arg4[%c0_33, %c6] : memref<2x9xf32, #tpu.memory_space<vmem>>, vector<2x1xf32>
    %38 = vector.broadcast %37 : vector<2x1xf32> to vector<2x256xf32>
    %39 = arith.mulf %36, %38 : vector<2x256xf32>
    %40 = arith.addf %34, %39 : vector<2x256xf32>
    %41 = vector.broadcast %0 : vector<1x256xf32> to vector<2x256xf32>
    %42 = arith.mulf %40, %41 : vector<2x256xf32>
    %c0_34 = arith.constant 0 : index
    %c0_35 = arith.constant 0 : index
    %c1_36 = arith.constant 1 : index
    %43 = vector.load %arg10[%c0_34, %c0_35, %c1_36] : memref<1x2x290xf32, #tpu.memory_space<vmem>>, vector<1x2x256xf32>
    %44 = vector.shape_cast %43 : vector<1x2x256xf32> to vector<2x256xf32>
    %c0_37 = arith.constant 0 : index
    %c1_38 = arith.constant 1 : index
    %45 = vector.load %arg4[%c0_37, %c1_38] : memref<2x9xf32, #tpu.memory_space<vmem>>, vector<2x1xf32>
    %46 = vector.broadcast %45 : vector<2x1xf32> to vector<2x256xf32>
    %47 = arith.mulf %44, %46 : vector<2x256xf32>
    %c0_39 = arith.constant 0 : index
    %c0_40 = arith.constant 0 : index
    %c17_41 = arith.constant 17 : index
    %48 = vector.load %arg10[%c0_39, %c0_40, %c17_41] : memref<1x2x290xf32, #tpu.memory_space<vmem>>, vector<1x2x256xf32>
    %49 = vector.shape_cast %48 : vector<1x2x256xf32> to vector<2x256xf32>
    %c0_42 = arith.constant 0 : index
    %c4 = arith.constant 4 : index
    %50 = vector.load %arg4[%c0_42, %c4] : memref<2x9xf32, #tpu.memory_space<vmem>>, vector<2x1xf32>
    %51 = vector.broadcast %50 : vector<2x1xf32> to vector<2x256xf32>
    %52 = arith.mulf %49, %51 : vector<2x256xf32>
    %53 = arith.addf %47, %52 : vector<2x256xf32>
    %c0_43 = arith.constant 0 : index
    %c0_44 = arith.constant 0 : index
    %c33 = arith.constant 33 : index
    %54 = vector.load %arg10[%c0_43, %c0_44, %c33] : memref<1x2x290xf32, #tpu.memory_space<vmem>>, vector<1x2x256xf32>
    %55 = vector.shape_cast %54 : vector<1x2x256xf32> to vector<2x256xf32>
    %c0_45 = arith.constant 0 : index
    %c7 = arith.constant 7 : index
    %56 = vector.load %arg4[%c0_45, %c7] : memref<2x9xf32, #tpu.memory_space<vmem>>, vector<2x1xf32>
    %57 = vector.broadcast %56 : vector<2x1xf32> to vector<2x256xf32>
    %58 = arith.mulf %55, %57 : vector<2x256xf32>
    %59 = arith.addf %53, %58 : vector<2x256xf32>
    %60 = arith.addf %42, %59 : vector<2x256xf32>
    %c0_46 = arith.constant 0 : index
    %c0_47 = arith.constant 0 : index
    %c2 = arith.constant 2 : index
    %61 = vector.load %arg10[%c0_46, %c0_47, %c2] : memref<1x2x290xf32, #tpu.memory_space<vmem>>, vector<1x2x256xf32>
    %62 = vector.shape_cast %61 : vector<1x2x256xf32> to vector<2x256xf32>
    %c0_48 = arith.constant 0 : index
    %c2_49 = arith.constant 2 : index
    %63 = vector.load %arg4[%c0_48, %c2_49] : memref<2x9xf32, #tpu.memory_space<vmem>>, vector<2x1xf32>
    %64 = vector.broadcast %63 : vector<2x1xf32> to vector<2x256xf32>
    %65 = arith.mulf %62, %64 : vector<2x256xf32>
    %c0_50 = arith.constant 0 : index
    %c0_51 = arith.constant 0 : index
    %c18 = arith.constant 18 : index
    %66 = vector.load %arg10[%c0_50, %c0_51, %c18] : memref<1x2x290xf32, #tpu.memory_space<vmem>>, vector<1x2x256xf32>
    %67 = vector.shape_cast %66 : vector<1x2x256xf32> to vector<2x256xf32>
    %c0_52 = arith.constant 0 : index
    %c5 = arith.constant 5 : index
    %68 = vector.load %arg4[%c0_52, %c5] : memref<2x9xf32, #tpu.memory_space<vmem>>, vector<2x1xf32>
    %69 = vector.broadcast %68 : vector<2x1xf32> to vector<2x256xf32>
    %70 = arith.mulf %67, %69 : vector<2x256xf32>
    %71 = arith.addf %65, %70 : vector<2x256xf32>
    %c0_53 = arith.constant 0 : index
    %c0_54 = arith.constant 0 : index
    %c34 = arith.constant 34 : index
    %72 = vector.load %arg10[%c0_53, %c0_54, %c34] : memref<1x2x290xf32, #tpu.memory_space<vmem>>, vector<1x2x256xf32>
    %73 = vector.shape_cast %72 : vector<1x2x256xf32> to vector<2x256xf32>
    %c0_55 = arith.constant 0 : index
    %c8 = arith.constant 8 : index
    %74 = vector.load %arg4[%c0_55, %c8] : memref<2x9xf32, #tpu.memory_space<vmem>>, vector<2x1xf32>
    %75 = vector.broadcast %74 : vector<2x1xf32> to vector<2x256xf32>
    %76 = arith.mulf %73, %75 : vector<2x256xf32>
    %77 = arith.addf %71, %76 : vector<2x256xf32>
    %78 = vector.broadcast %1 : vector<1x256xf32> to vector<2x256xf32>
    %79 = arith.mulf %77, %78 : vector<2x256xf32>
    %80 = arith.addf %60, %79 : vector<2x256xf32>
    %c0_56 = arith.constant 0 : index
    %c0_57 = arith.constant 0 : index
    %81 = vector.load %arg5[%c0_56, %c0_57] : memref<2x1xf32, #tpu.memory_space<vmem>>, vector<2x1xf32>
    %82 = vector.broadcast %81 : vector<2x1xf32> to vector<2x256xf32>
    %83 = arith.addf %80, %82 : vector<2x256xf32>
    %c0_58 = arith.constant 0 : index
    %c0_59 = arith.constant 0 : index
    %84 = vector.load %arg6[%c0_58, %c0_59] : memref<2x2xbf16, #tpu.memory_space<vmem>>, vector<2x2xbf16>
    %85 = arith.truncf %83 : vector<2x256xf32> to vector<2x256xbf16>
    %cst_60 = arith.constant dense<0.000000e+00> : vector<2x256xf32>
    %86 = tpu.matmul %84, %85, %cst_60 {dimension_numbers = #tpu.dot_dimension_numbers<[1], [0], [0], [1], [0, 0, 1, 1], [], []>} : vector<2x2xbf16>, vector<2x256xbf16>, vector<2x256xf32> -> vector<2x256xf32>
    %c0_61 = arith.constant 0 : index
    %c0_62 = arith.constant 0 : index
    %87 = vector.load %arg7[%c0_61, %c0_62] : memref<2x1xf32, #tpu.memory_space<vmem>>, vector<2x1xf32>
    %88 = vector.broadcast %87 : vector<2x1xf32> to vector<2x256xf32>
    %89 = arith.addf %86, %88 : vector<2x256xf32>
    %cst_63 = arith.constant 0.000000e+00 : f32
    %90 = vector.broadcast %cst_63 : f32 to vector<2x256xf32>
    %91 = arith.maximumf %89, %90 : vector<2x256xf32>
    %c0_64 = arith.constant 0 : index
    %c0_65 = arith.constant 0 : index
    %c0_66 = arith.constant 0 : index
    %92 = vector.load %arg9[%c0_64, %c0_65, %c0_66] : memref<1x2x512xf32, #tpu.memory_space<vmem>>, vector<1x2x256xf32>
    %93 = vector.shape_cast %92 : vector<1x2x256xf32> to vector<2x256xf32>
    %94 = vector.shape_cast %4 : vector<2x256xf32> to vector<1x2x256xf32>
    tpu.vector_store %arg9[%c0_64, %c0_65, %c0_66], %94 {strides = array<i32>} : memref<1x2x512xf32, #tpu.memory_space<vmem>>, vector<1x2x256xf32>,
    %c0_67 = arith.constant 0 : index
    %c0_68 = arith.constant 0 : index
    %c256 = arith.constant 256 : index
    %95 = vector.load %arg9[%c0_67, %c0_68, %c256] : memref<1x2x512xf32, #tpu.memory_space<vmem>>, vector<1x2x256xf32>
    %96 = vector.shape_cast %95 : vector<1x2x256xf32> to vector<2x256xf32>
    %97 = vector.shape_cast %91 : vector<2x256xf32> to vector<1x2x256xf32>
    tpu.vector_store %arg9[%c0_67, %c0_68, %c256], %97 {strides = array<i32>} : memref<1x2x512xf32, #tpu.memory_space<vmem>>, vector<1x2x256xf32>,
    return
  }
  func.func @transform_0(%arg0: i32) -> (i32, i32, i32, i32) {
    %c0_i32 = arith.constant 0 : i32
    %c0_i32_0 = arith.constant 0 : i32
    %c0_i32_1 = arith.constant 0 : i32
    %c0_i32_2 = arith.constant 0 : i32
    return %arg0, %c0_i32, %c0_i32_0, %c0_i32_1 : i32, i32, i32, i32
  }
  func.func @transform_1(%arg0: i32) -> (i32, i32) {
    %c0_i32 = arith.constant 0 : i32
    %c0_i32_0 = arith.constant 0 : i32
    %c0_i32_1 = arith.constant 0 : i32
    return %c0_i32, %c0_i32_0 : i32, i32
  }
  func.func @transform_2(%arg0: i32) -> (i32, i32) {
    %c0_i32 = arith.constant 0 : i32
    %c0_i32_0 = arith.constant 0 : i32
    %c0_i32_1 = arith.constant 0 : i32
    return %c0_i32, %c0_i32_0 : i32, i32
  }
  func.func @transform_3(%arg0: i32) -> (i32, i32) {
    %c0_i32 = arith.constant 0 : i32
    %c0_i32_0 = arith.constant 0 : i32
    %c0_i32_1 = arith.constant 0 : i32
    return %c0_i32, %c0_i32_0 : i32, i32
  }
  func.func @transform_4(%arg0: i32) -> (i32, i32) {
    %c0_i32 = arith.constant 0 : i32
    %c0_i32_0 = arith.constant 0 : i32
    %c0_i32_1 = arith.constant 0 : i32
    return %c0_i32, %c0_i32_0 : i32, i32
  }
  func.func @transform_5(%arg0: i32) -> (i32, i32) {
    %c0_i32 = arith.constant 0 : i32
    %c0_i32_0 = arith.constant 0 : i32
    %c0_i32_1 = arith.constant 0 : i32
    return %c0_i32, %c0_i32_0 : i32, i32
  }
  func.func @transform_6(%arg0: i32) -> (i32, i32) {
    %c0_i32 = arith.constant 0 : i32
    %c0_i32_0 = arith.constant 0 : i32
    %c0_i32_1 = arith.constant 0 : i32
    return %c0_i32, %c0_i32_0 : i32, i32
  }
  func.func @transform_7(%arg0: i32) -> (i32, i32) {
    %c0_i32 = arith.constant 0 : i32
    %c0_i32_0 = arith.constant 0 : i32
    %c0_i32_1 = arith.constant 0 : i32
    return %c0_i32, %c0_i32_0 : i32, i32
  }
  func.func @transform_8(%arg0: i32) -> (i32, i32, i32) {
    %c0_i32 = arith.constant 0 : i32
    %c0_i32_0 = arith.constant 0 : i32
    %c0_i32_1 = arith.constant 0 : i32
    return %arg0, %c0_i32, %c0_i32_0 : i32, i32, i32
  }
}

</mosaic_0001>

<bundles_post_ra>
// kernel: inverted_residual_forward.1
= control target key start
LH: loop header
LB: loop body
LE: loop exit
PB: predicated region body
PF: predicated region fallthrough
CT: control target
= control target key end

     0   :  { %s801_s27 = smov 0   ;;  %s895_s0 = inlined_call_operand.vmem [shape: f32[2,2,2,256], index: 0, kind: input, shape index: {}]   ;;  %s896_s1 = inlined_call_operand.vmem [shape: bf16[2,2], index: 1, kind: input, shape index: {}]   ;;  %s897_s2 = inlined_call_operand.vmem [shape: f32[2,1], index: 2, kind: input, shape index: {}]   ;;  %s898_s3 = inlined_call_operand.vmem [shape: f32[2,9], index: 3, kind: input, shape index: {}]   ;;  %s899_s4 = inlined_call_operand.vmem [shape: f32[2,1], index: 4, kind: input, shape index: {}]   ;;  %s900_s5 = inlined_call_operand.vmem [shape: bf16[2,2], index: 5, kind: input, shape index: {}]   ;;  %s901_s6 = inlined_call_operand.vmem [shape: f32[2,1], index: 6, kind: input, shape index: {}]   ;;  %s902_s7 = inlined_call_operand.vmem [shape: f32[2,256], index: 7, kind: input, shape index: {}]   ;;  %s903_s8 = inlined_call_operand.vmem [shape: f32[2,2,512], index: 8, kind: output, shape index: {}]  }
   0x1 LB: > { %s676_s28 = sadd.s32 4294967295, %s737_s27   ;;  %p680_p0 = scmp.ge.s32.totalorder %s737_s27, 1  ;;  %s737_s27 = sphi %s801_s27, %s18_s27  }
   0x2   : > { %p262_p1 = scmp.lt.s32.totalorder %s737_s27, 3 }
   0x4   : > { %p263_p2 = pnand %p680_p0, %p262_p1 }
   0x5   : > { %p296_p3 = scmp.lt.s32.totalorder (!%p263_p2), %s676_s28, 1  ;;  %s748_s17 = smov (!%p263_p2), 17  }
   0x6   : > { %266 = sbr.rel (%p263_p2) target bundleno = 688 (0x2b0), region = 52  ;;  %s751_s20 = smov (!%p263_p2), 112  }
   0x7   : > { %s752_s21 = smov (!%p263_p2), 96   ;;  %s753_s22 = smov (!%p263_p2), 2  }
   0x8   : > { %s754_s25 = smov (!%p263_p2), 127   ;;  %s755_s30 = smov (!%p263_p2), 126  }
   0xb   : > { %v739_v0 = vmov 0   ;;  %v322_v1 = vld [vmem:[%s897_s2] sm:$0x3]  ;;  %s905_s28 = smov (!%p296_p3, %s676_s28), 1  ;;  %v740_v3 = vmov 4   ;;  %v741_v5 = vmov 5  }
   0xc   : > { %720 = vset.pattern.permute.xlu0 %v739_v0  ;;  %v815_v2 = vld [vmem:[%s898_s3] sm:$0x3]  ;;  %721 = vset.pattern.permute.xlu1 %v740_v3  ;;  %s693_s11 = sshll.u32 %s905_s28, 3  ;;  %vm332_vm0 = vcmask 1040384   ;;  %vm328_vm1 = vcmask 15360   ;;  %v742_v13 = vmov 6  }
   0xd   : > { %325 = vperm.xlu0 %720, %v322_v1   ;;  %452 = vperm.xlu1 %721, %v815_v2   ;;  %s826_s14 = scalar_lea.vmem %s895_s0, %s693_s11  ;;  %v313_v12 = vld [vmem:[%s896_s1] sm:$0x1]  ;;  %v743_v14 = vmov 3   ;;  %v744_v15 = vmov 2   ;;  %v745_v16 = vmov 7   ;;  %v746_v17 = vmov 8  }
   0xe   : > { %v686_v4 = vld [vmem:[%s826_s14 + $0x4] sm:$0xf]  ;;  %723 = vset.pattern.permute.xlu2 %v745_v16  ;;  %v747_v24 = vmov 1   ;;  %vm374_vm2 = vcmask 1041408   ;;  %vm367_vm3 = vcmask 132096   ;;  %vm369_vm4 = vcmask 271496  }
   0xf   : > { %315 = vst [vmem:[#allocation1] ss:$4 sm:$0xff] %v686_v4  ;;  %468 = vperm.xlu2 %723, %v815_v2   ;;  %v749_v30 = vmov 0.0   ;;  %vm382_vm5 = vcmask 1041544   ;;  %vm383_vm6 = vcmask 1043458   ;;  %vm385_vm8 = vcmask 136196  }
  0x10   : > { %368 = vst.msk [vmem:[#allocation2] sm:$0x3] %vm367_vm3, %v749_v30  ;;  %vm384_vm7 = vmor %vm383_vm6, %vm382_vm5  ;;  %vm379_vm9 = vcmask 138240   ;;  %v750_v33 = vmov 269488144   ;;  %vm414_vm11 = vcmask 916480  }
  0x11   : > { %370 = vst.msk [vmem:[#allocation2 + $0x4] sm:$0x3] %vm369_vm4, %v749_v30  ;;  %v395_v34 = vunpack.c.l.s4 %v750_v33  ;;  %vm386_vm10 = vmor %vm385_vm8, %vm384_vm7  ;;  %v685_v43 = vld [vmem:[%s902_s7 + $0x1] ss:$2 sm:$0x3]  ;;  %vm431_vm12 = vcmask 785408  }
  0x12   : > { %v534_v45 = vperm.slane %v685_v43, 1  ;;  %v533_v49 = vperm.slane %v685_v43, 0  ;;  %v551_v61 = vld [vmem:[%s899_s4] sm:$0x3]  ;;  %vm487_vm13 = vcmask 1039360   ;;  %vm547_vm14 = vcmask 1031168  }
  0x13   : > { %v844_v37 = vunpack.c.0.s8 %v395_v34 }
  0x14   : > { %v535_v50 = vrot.slane %v534_v45, 6 }
  0x15   : > { %722 = vset.pattern.permute.xlu1 %v741_v5  ;;  %725 = vset.pattern.permute.xlu0 %v743_v14 }
  0x16   : > { %501 = vperm.xlu1 %722, %v815_v2   ;;  %v316_v6 = vld.sshfl [vmem:[#allocation1] sm:$0xff pattern:$0x73625140]  ;;  %v317_v7 = vld.sshfl [vmem:[#allocation1 + $0x8] sm:$0xff pattern:$0x73625140]  ;;  %v536_v53 = vsel %vm374_vm2, %v533_v49, %v535_v50 }
  0x17   : > { %v320_v8 = vpack.c.bf16 %v316_v6, %v316_v6  ;;  %v321_v9 = vpack.c.bf16 %v317_v7, %v317_v7  ;;  %724 = vset.pattern.permute.xlu2 %v746_v17 }
  0x18   : > { %517 = vperm.xlu2 %724, %v815_v2  }
  0x19   : > { %v334_v10 = vsel %vm332_vm0, %v320_v8, 0  ;;  %v337_v11 = vsel %vm332_vm0, %v321_v9, 0 }
  0x1a   : > { %346 = vmatpush.bf16.msra.mxu0 %v334_v10  ;;  %359 = vmatpush.bf16.msra.mxu1 %v337_v11 }
  0x1d   : > { %687 = vmatmul.msk.bf16.vlgmr.msra.gmra.mxu0 %vm328_vm1, %v313_v12  ;;  %688 = vmatmul.msk.bf16.vlgmr.msra.gmra.mxu1 %vm328_vm1, %v313_v12 }
  0x1e   : > { %726 = vset.pattern.permute.xlu1 %v742_v13 }
  0x1f   : > { %419 = vperm.xlu1 %726, %v815_v2  }
  0x20   : > { %727 = vset.pattern.permute.xlu2 %v747_v24 }
  0x21   : > { %443 = vperm.xlu2 %727, %v815_v2  }
  0x27   : > { %728 = vset.pattern.permute.xlu1 %v744_v15 }
  0x28   : > { %492 = vperm.xlu1 %728, %v815_v2  }
  0x30   : > { %729 = vset.pattern.permute.xlu1 %v739_v0 }
  0x69   : > { %v469_v38 = vpop.permute.xlu2 %468 }
  0x6a   : > { %v473_v41 = vperm.slane %v469_v38, %v844_v37  ;;  %v307_v38 = vld [vmem:[%s902_s7] ss:$2 sm:$0x3] }
  0x72   : > { %v518_v51 = vpop.permute.xlu2 %517 }
  0x73   : > { %v522_v52 = vperm.slane %v518_v51, %v844_v37 }
  0x7b   : > { %v444_v62 = vpop.permute.xlu2 %443 }
  0x7f   : > { %v326_v18 = vpop.permute.xlu0 %325  ;;  %v453_v31 = vpop.permute.xlu1 %452 }
  0x80   : > { %v457_v40 = vperm.slane %v453_v31, %v844_v37 }
  0x88   : > { %v502_v39 = vpop.permute.xlu1 %501 }
  0x89   : > { %v506_v42 = vperm.slane %v502_v39, %v844_v37  ;;  %v437_v39 = vperm.slane %v307_v38, 1 }
  0x91   : > { %v420_v56 = vpop.permute.xlu1 %419 }
  0x92   : > { %v424_v57 = vperm.slane %v420_v56, %v844_v37 }
  0x9a   : > { %v348_v19 = vpop.f32.mrf.mxu0  ;;  %v361_v20 = vpop.f32.mrf.mxu1 }
  0x9b   : > { %v349_v21 = vadd.f32 %v348_v19, %v326_v18  ;;  %v362_v22 = vadd.f32 %v361_v20, %v326_v18 }
  0x9d   : > { %v366_v23 = vmax.f32 %v362_v22, 0.0  ;;  %v365_v25 = vmax.f32 %v349_v21, 0.0 }
  0x9f   : > { %v373_v26 = vrot.slane %v366_v23, 6 }
  0xa1   : > { %v375_v27 = vsel %vm374_vm2, %v365_v25, %v373_v26  ;;  %v571_v26 = vld [vmem:[%s901_s6] sm:$0x3] }
  0xa2   : > { %v350_v28 = vpop.f32.mrf.mxu0  ;;  %v363_v29 = vpop.f32.mrf.mxu1  ;;  %376 = vrot.lane.b32.xlu0 %v375_v27, %s748_s17  ;;  %s305_s17 = scalar_lea.vmem %s903_s8, %s693_s11 }
  0xaa   : > { %402 = vperm.xlu0 %725, %v815_v2  }
  0xb2   : > { %730 = vset.pattern.permute.xlu0 %v739_v0  ;;  %v493_v0 = vpop.permute.xlu1 %492 }
  0xb3   : > { %v497_v6 = vperm.slane %v493_v0, %v844_v37 }
 0x114   : > { %v377_v32 = vpop.permute.xlu0 %376 }
 0x115   : > { %v378_v35 = vrot.slane %v377_v32, 6 }
 0x117   : > { %v380_v36 = vsel %vm379_vm9, %v378_v35, %v377_v32 }
 0x118   : > { %387 = vst.msk [vmem:[#allocation2] sm:$0x3f] %vm386_vm10, %v380_v36 }
 0x11c   : > { %v403_v55 = vpop.permute.xlu0 %402 }
 0x11d   : > { %v407_v58 = vperm.slane %v403_v55, %v844_v37 }
 0x11f   : > { %v400_v44 = vld [vmem:[#allocation2] sm:$0x3f] }
 0x120   : > { %v508_v46 = vmul.f32 %v506_v42, %v400_v44  ;;  %v475_v47 = vmul.f32 %v473_v41, %v400_v44  ;;  %v459_v48 = vmul.f32 %v457_v40, %v400_v44  ;;  %v524_v54 = vmul.f32 %v522_v52, %v400_v44  ;;  %v388_v29 = vld [vmem:[#allocation2] sm:$0xf] }
 0x121   : > { %v426_v59 = vmul.f32 %v424_v57, %v400_v44  ;;  %v409_v60 = vmul.f32 %v407_v58, %v400_v44  ;;  %v499_v14 = vmul.f32 %v497_v6, %v400_v44  ;;  %v436_v40 = vperm.slane %v307_v38, 0 }
 0x122   : > { %510 = vrot.lane.b32.xlu0 %v508_v46, %s751_s20  ;;  %477 = vrot.lane.b32.xlu1 %v475_v47, %s752_s21  ;;  %v438_v41 = vrot.slane %v437_v39, 6 }
 0x123   : > { %461 = vrot.lane.b32.xlu2 %v459_v48, %s751_s20 }
 0x124   : > { %v439_v43 = vsel %vm374_vm2, %v436_v40, %v438_v41 }
 0x12a   : > { %537 = vrot.lane.b32.xlu0 %v536_v53, %s753_s22  ;;  %392 = vperm.xlu1 %729, %v815_v2   ;;  %v448_v2 = vperm.slane %v444_v62, %v844_v37 }
 0x12b   : > { %526 = vrot.lane.b32.xlu2 %v524_v54, %s752_s21 }
 0x12c   : > { %v450_v5 = vmul.f32 %v448_v2, %v400_v44 }
 0x132   : > { %428 = vrot.lane.b32.xlu0 %v426_v59, %s752_s21 }
 0x133   : > { %411 = vrot.lane.b32.xlu2 %v409_v60, %s751_s20 }
 0x13a   : > { %554 = vperm.xlu0 %730, %v551_v61   ;;  %v310_v61 = vld [vmem:[%s826_s14] sm:$0xf] }
 0x13b   : > { %614 = vst [vmem:[%s305_s17] sm:$0xf] %v310_v61 }
 0x17d   : > { %v462_v63 = vpop.permute.xlu2 %461 }
 0x17e   : > { %v463_v1 = vrot.slane %v462_v63, 2 }
 0x180   : > { %v464_v3 = vsel %vm414_vm11, %v462_v63, %v463_v1 }
 0x181   : > { %v466_v11 = vadd.f32 %v464_v3, %v450_v5 }
 0x185   : > { %v527_v4 = vpop.permute.xlu2 %526 }
 0x186   : > { %v528_v16 = vrot.slane %v527_v4, 2 }
 0x188   : > { %v529_v20 = vsel %vm431_vm12, %v527_v4, %v528_v16 }
 0x18d   : > { %v412_v22 = vpop.permute.xlu2 %411 }
 0x18e   : > { %v413_v28 = vrot.slane %v412_v22, 2 }
 0x190   : > { %v415_v32 = vsel %vm414_vm11, %v412_v22, %v413_v28 }
 0x194   : > { %v478_v7 = vpop.permute.xlu1 %477  ;;  %v511_v8 = vpop.permute.xlu0 %510 }
 0x195   : > { %v479_v9 = vrot.slane %v478_v7, 2  ;;  %v512_v10 = vrot.slane %v511_v8, 2 }
 0x197   : > { %v480_v12 = vsel %vm431_vm12, %v478_v7, %v479_v9  ;;  %v513_v13 = vsel %vm414_vm11, %v511_v8, %v512_v10 }
 0x198   : > { %v482_v15 = vadd.f32 %v480_v12, %v466_v11  ;;  %v515_v17 = vadd.f32 %v513_v13, %v499_v14 }
 0x19a   : > { %484 = vrot.lane.b32.xlu1 %v482_v15, %s754_s25  ;;  %v531_v24 = vadd.f32 %v529_v20, %v515_v17 }
 0x19c   : > { %v393_v18 = vpop.permute.xlu1 %392  ;;  %v538_v19 = vpop.permute.xlu0 %537 }
 0x19d   : > { %v539_v21 = vrot.slane %v538_v19, 6  ;;  %v397_v23 = vperm.slane %v393_v18, %v844_v37 }
 0x19f   : > { %v540_v25 = vsel %vm328_vm1, %v539_v21, %v538_v19  ;;  %v399_v30 = vmul.f32 %v397_v23, %v388_v29 }
 0x1a0   : > { %v542_v27 = vmul.f32 %v540_v25, %v531_v24 }
 0x1a1   : > { %v417_v34 = vadd.f32 %v415_v32, %v399_v30 }
 0x1a2   : > { %574 = vperm.xlu1 %729, %v571_v26   ;;  %544 = vrot.lane.b32.xlu2 %v542_v27, %s755_s30 }
 0x1a4   : > { %v429_v31 = vpop.permute.xlu0 %428 }
 0x1a5   : > { %v430_v33 = vrot.slane %v429_v31, 2 }
 0x1a7   : > { %v432_v35 = vsel %vm431_vm12, %v429_v31, %v430_v33 }
 0x1a8   : > { %v434_v36 = vadd.f32 %v432_v35, %v417_v34 }
 0x1aa   : > { %v441_v48 = vmul.f32 %v439_v43, %v434_v36 }
 0x1ac   : > { %v555_v47 = vpop.permute.xlu0 %554 }
 0x1ad   : > { %v559_v51 = vperm.slane %v555_v47, %v844_v37  ;;  %v562_v37 = vld [vmem:[%s900_s5] sm:$0x1] }
 0x1fc   : > { %v545_v42 = vpop.permute.xlu2 %544 }
 0x1fd   : > { %v546_v45 = vrot.slane %v545_v42, 2 }
 0x1ff   : > { %v548_v52 = vsel %vm547_vm14, %v545_v42, %v546_v45 }
 0x20c   : > { %v485_v44 = vpop.permute.xlu1 %484 }
 0x20d   : > { %v486_v46 = vrot.slane %v485_v44, 2 }
 0x20f   : > { %v488_v49 = vsel %vm487_vm13, %v485_v44, %v486_v46 }
 0x210   : > { %v490_v50 = vadd.f32 %v488_v49, %v441_v48 }
 0x212   : > { %v550_v53 = vadd.f32 %v548_v52, %v490_v50 }
 0x214   : > { %v561_v54 = vadd.f32 %v559_v51, %v550_v53  ;;  %v575_v62 = vpop.permute.xlu1 %574 }
 0x216   : > { %564 = vst [vmem:[#allocation1] ss:$4 sm:$0xff] %v561_v54 }
 0x21d   : > { %v565_v55 = vld.sshfl [vmem:[#allocation1] sm:$0xff pattern:$0x73625140]  ;;  %v566_v56 = vld.sshfl [vmem:[#allocation1 + $0x8] sm:$0xff pattern:$0x73625140] }
 0x21e   : > { %v569_v57 = vpack.c.bf16 %v565_v55, %v565_v55  ;;  %v570_v58 = vpack.c.bf16 %v566_v56, %v566_v56 }
 0x220   : > { %v581_v59 = vsel %vm332_vm0, %v569_v57, 0  ;;  %v584_v60 = vsel %vm332_vm0, %v570_v58, 0 }
 0x221   : > { %593 = vmatpush.bf16.msra.mxu2 %v581_v59  ;;  %606 = vmatpush.bf16.msra.mxu3 %v584_v60 }
 0x224   : > { %689 = vmatmul.msk.bf16.vlgmr.msra.gmra.mxu2 %vm328_vm1, %v562_v37  ;;  %690 = vmatmul.msk.bf16.vlgmr.msra.gmra.mxu3 %vm328_vm1, %v562_v37 }
 0x2a7   : > { %v595_v63 = vpop.f32.mrf.mxu2  ;;  %v608_v0 = vpop.f32.mrf.mxu3 }
 0x2a8   : > { %v596_v1 = vadd.f32 %v595_v63, %v575_v62  ;;  %v609_v2 = vadd.f32 %v608_v0, %v575_v62 }
 0x2aa   : > { %v613_v3 = vmax.f32 %v609_v2, 0.0  ;;  %v612_v4 = vmax.f32 %v596_v1, 0.0 }
 0x2ac   : > { %v617_v5 = vrot.slane %v613_v3, 6 }
 0x2ae   : > { %v618_v6 = vsel %vm374_vm2, %v612_v4, %v617_v5 }
 0x2af   : > { %620 = vst [vmem:[%s305_s17 + $0x4] sm:$0xf] %v618_v6  ;;  %v597_v7 = vpop.f32.mrf.mxu2  ;;  %v610_v8 = vpop.f32.mrf.mxu3 }
 0x2b0 PF: > { %s18_s27 = sadd.s32 1, %s737_s27  }
 0x2b1   : > { %p15_p4 = scmp.ge.s32.totalorder %s18_s27, 4  }
 0x2b3   :  { %17 = sbr.rel (!%p15_p4) target bundleno = 1 (0x1), region = 84 }

</bundles_post_ra>
